<compile_context>
chip_gen: v5e
topology: v5e:2x2
jax: 0.10.0
libtpu: 0.0.40
codegen_flags: <defaults>
</compile_context>

<pallas_src>
import functools

import jax
import jax.numpy as jnp
from jax import lax
from jax.experimental import pallas as pl
from jax.experimental.pallas import tpu as pltpu  # noqa: F401  (kept for TPU-specific knobs)

BN_EPS = 1e-5
LANE = 128
# Set to lax.Precision.HIGHEST for strict f32 parity with torch's nn.Linear.
MATMUL_PRECISION = None

_dot = functools.partial(jnp.dot, preferred_element_type=jnp.float32,
                         precision=MATMUL_PRECISION)


# ---------------------------------------------------------------------------
# In-kernel building blocks
# ---------------------------------------------------------------------------
def _bn_sigmoid(z, gamma, beta):
    """Training-mode BatchNorm1d (biased batch variance) + sigmoid, fused."""
    inv_b = 1.0 / z.shape[0]                       # compile-time constant
    s1 = jnp.sum(z, axis=0, keepdims=True)         # [1, m_pad]
    s2 = jnp.sum(z * z, axis=0, keepdims=True)     # [1, m_pad]
    mean = s1 * inv_b
    var = jnp.maximum(s2 * inv_b - mean * mean, 0.0)   # clamp one-pass variance
    scale = gamma * lax.rsqrt(var + BN_EPS)
    shift = beta - mean * scale
    return jax.nn.sigmoid(z * scale + shift)       # logistic -> EUP slot


# ---------------------------------------------------------------------------
# Kernels
# ---------------------------------------------------------------------------
def memory_nn_kernel(x_ref, a_ref, m_ref, w_ref, p_ref, out_ref):
    """Single MemoryNN step.

    w_ref: [I+Tg+M, m_pad] packed weight; static row slices are free.
    p_ref rows: 0=bias, 1=gamma, 2=beta.
    """
    i = x_ref.shape[1]
    t = a_ref.shape[1]
    z = (_dot(x_ref[...], w_ref[0:i, :])
         + _dot(a_ref[...], w_ref[i:i + t, :])
         + _dot(m_ref[...], w_ref[i + t:, :])
         + p_ref[0:1, :])
    out_ref[...] = _bn_sigmoid(z, p_ref[1:2, :], p_ref[2:3, :])


def memory_nn_seq_kernel(xa_ref, m0_ref, w_ref, p_ref, out_ref):
    """T recurrent MemoryNN steps, looped entirely inside one kernel (grid=())."""
    T = xa_ref.shape[0]
    it = xa_ref.shape[2]              # I + Tg
    memory_dim = m0_ref.shape[1]

    # Loop-invariant loads: weights / BN params live in vregs across all steps.
    w_xa = w_ref[0:it, :]             # [I+Tg, m_pad]
    w_m = w_ref[it:, :]               # [M, m_pad]   (K = M, no zero rows)
    bias = p_ref[0:1, :]
    gamma = p_ref[1:2, :]
    beta = p_ref[2:3, :]

    def step(t, mem):                 # mem: [B, M] -- real columns only
        z = _dot(xa_ref[t], w_xa) + _dot(mem, w_m) + bias
        y = _bn_sigmoid(z, gamma, beta)          # [B, m_pad]
        out_ref[t] = y
        return y[:, :memory_dim]      # padded lanes (=0.5) never feed back

    lax.fori_loop(0, T, step, m0_ref[...], unroll=True)


# ---------------------------------------------------------------------------
# Wrappers
# ---------------------------------------------------------------------------
def prepare_params(weight_t, bias, gamma, beta):
    """ONE-TIME prep (hoist this out of the step loop and reuse the results).

    Returns:
      w      [flat_size, m_pad] f32 : lane-padded packed Linear weight (x|a|m rows)
      params [8, m_pad]        f32 : row 0 = bias, row 1 = gamma, row 2 = beta
    """
    flat_size, memory_dim = weight_t.shape
    m_pad = pl.cdiv(memory_dim, LANE) * LANE
    w = jnp.pad(weight_t.astype(jnp.float32), ((0, 0), (0, m_pad - memory_dim)))
    params = jnp.zeros((8, m_pad), jnp.float32)
    params = params.at[0, :memory_dim].set(bias.astype(jnp.float32))
    params = params.at[1, :memory_dim].set(gamma.astype(jnp.float32))
    params = params.at[2, :memory_dim].set(beta.astype(jnp.float32))
    return w, params


def memory_nn_forward(input_symbol, action, memory, w, params):
    """Single step: (x [B,I], action [B,Tg], memory [B,M]) -> [B,M].

    `w`, `params` come from prepare_params() (called once, not per step).
    """
    B, input_dim = input_symbol.shape
    target_dim = action.shape[1]
    memory_dim = memory.shape[1]
    flat_size, m_pad = w.shape

    cost = pl.CostEstimate(
        flops=2 * B * flat_size * m_pad + 12 * B * m_pad,
        transcendentals=B * m_pad,
        bytes_accessed=4 * (B * (flat_size + m_pad) + flat_size * m_pad + 8 * m_pad),
    )
    full = lambda shape: pl.BlockSpec(shape, lambda: (0,) * len(shape))
    out = pl.pallas_call(
        memory_nn_kernel,
        out_shape=jax.ShapeDtypeStruct((B, m_pad), jnp.float32),
        grid=(),
        in_specs=[
            full((B, input_dim)),
            full((B, target_dim)),
            full((B, memory_dim)),
            full((flat_size, m_pad)),   # one packed weight DMA
            full((8, m_pad)),           # bias/gamma/beta in one vreg-sized DMA
        ],
        out_specs=full((B, m_pad)),
        cost_estimate=cost,
    )(input_symbol, action, memory, w, params)
    return out[:, :memory_dim]


def memory_nn_sequence(input_seq, action_seq, memory0, w, params):
    """Fused recurrence: T MemoryNN steps in ONE pallas_call, looped in-kernel.

    input_seq [T,B,I], action_seq [T,B,Tg], memory0 [B,M] -> memories [T,B,M].
    """
    T, B, input_dim = input_seq.shape
    target_dim = action_seq.shape[2]
    memory_dim = memory0.shape[1]
    flat_size, m_pad = w.shape

    # One cheap concat per sequence (amortized over T) -> 2 dots per step.
    xa_seq = jnp.concatenate(
        (input_seq.astype(jnp.float32), action_seq.astype(jnp.float32)), axis=2)

    cost = pl.CostEstimate(
        flops=T * (2 * B * flat_size * m_pad + 12 * B * m_pad),
        transcendentals=T * B * m_pad,
        bytes_accessed=4 * (T * B * (input_dim + target_dim + m_pad)
                            + B * memory_dim + flat_size * m_pad + 8 * m_pad),
    )
    full = lambda shape: pl.BlockSpec(shape, lambda: (0,) * len(shape))
    # TODO(synk): with multiple independent sequences, add a leading "parallel"
    # grid axis over them so both v7x TensorCores are used.
    out = pl.pallas_call(
        memory_nn_seq_kernel,
        out_shape=jax.ShapeDtypeStruct((T, B, m_pad), jnp.float32),
        grid=(),
        in_specs=[
            full((T, B, input_dim + target_dim)),   # whole sequence fits VMEM (~6 KiB)
            full((B, memory_dim)),
            full((flat_size, m_pad)),
            full((8, m_pad)),
        ],
        out_specs=full((T, B, m_pad)),
        cost_estimate=cost,
    )(xa_seq, memory0.astype(jnp.float32), w, params)
    return out[..., :memory_dim]


# ---------------------------------------------------------------------------
# Pure-JAX references
# ---------------------------------------------------------------------------
def reference_forward(input_symbol, action, memory, weight_t, bias, gamma, beta):
    flat = jnp.concatenate((input_symbol, action, memory), axis=1)
    z = jnp.dot(flat, weight_t, precision=MATMUL_PRECISION) + bias
    mean = jnp.mean(z, axis=0, keepdims=True)
    var = jnp.mean((z - mean) ** 2, axis=0, keepdims=True)
    y = (z - mean) / jnp.sqrt(var + BN_EPS) * gamma + beta
    return jax.nn.sigmoid(y)


def reference_sequence(input_seq, action_seq, memory0, weight_t, bias, gamma, beta):
    mem = memory0
    mems = []
    for t in range(input_seq.shape[0]):
        mem = reference_forward(input_seq[t], action_seq[t], mem,
                                weight_t, bias, gamma, beta)
        mems.append(mem)
    return jnp.stack(mems, axis=0)


# ---------------------------------------------------------------------------
# Demo / self-check
# ---------------------------------------------------------------------------
if __name__ == "__main__":
    batch = 8
    input_dim, target_dim, memory_dim = 16, 8, 32
    seq_len = 8
    flat_size = input_dim + target_dim + memory_dim

    key = jax.random.PRNGKey(0)
    k_in, k_act, k_mem, k_w, k_b, k_sin, k_sact = jax.random.split(key, 7)

    input_symbol = jax.random.normal(k_in, (batch, input_dim), jnp.float32)
    action = jax.random.normal(k_act, (batch, target_dim), jnp.float32)
    memory = jax.random.normal(k_mem, (batch, memory_dim), jnp.float32)

    # Deterministic nn.Linear-style init: U(-1/sqrt(fan_in), 1/sqrt(fan_in)).
    bound = 1.0 / (flat_size ** 0.5)
    weight_t = jax.random.uniform(k_w, (flat_size, memory_dim), jnp.float32,
                                  minval=-bound, maxval=bound)
    bias = jax.random.uniform(k_b, (memory_dim,), jnp.float32,
                              minval=-bound, maxval=bound)
    # BatchNorm1d default affine init.
    gamma = jnp.ones((memory_dim,), jnp.float32)
    beta = jnp.zeros((memory_dim,), jnp.float32)

    # --- hoisted one-time parameter prep (NOT repeated per call) ---
    w_packed, p_packed = prepare_params(weight_t, bias, gamma, beta)
    w_packed, p_packed = jax.block_until_ready((w_packed, p_packed))

    # --- single forward step (matches MemoryNN.forward) ---
    out = memory_nn_forward(input_symbol, action, memory, w_packed, p_packed)
    out = jax.block_until_ready(out)
    ref = reference_forward(input_symbol, action, memory,
                            weight_t, bias, gamma, beta)
    assert out.shape == (batch, memory_dim)
    assert jnp.allclose(out, ref, atol=5e-5, rtol=5e-5), "single-step mismatch"

    # --- fused recurrent sequence (launch/DMA/grid overhead amortized over T) ---
    input_seq = jax.random.normal(k_sin, (seq_len, batch, input_dim), jnp.float32)
    action_seq = jax.random.normal(k_sact, (seq_len, batch, target_dim), jnp.float32)
    seq_out = memory_nn_sequence(input_seq, action_seq, memory, w_packed, p_packed)
    seq_out = jax.block_until_ready(seq_out)
    seq_ref = reference_sequence(input_seq, action_seq, memory,
                                 weight_t, bias, gamma, beta)
    assert seq_out.shape == (seq_len, batch, memory_dim)
    assert jnp.allclose(seq_out, seq_ref, atol=2e-4, rtol=2e-4), "sequence mismatch"

    print("KERNEL_OK")
</pallas_src>

<mosaic_0001>
module attributes {stable_mosaic.version = 11 : i64} {
  func.func @memory_nn_kernel(%arg0: memref<8x16xf32, #tpu.memory_space<vmem>>, %arg1: memref<8x8xf32, #tpu.memory_space<vmem>>, %arg2: memref<8x32xf32, #tpu.memory_space<vmem>>, %arg3: memref<56x128xf32, #tpu.memory_space<vmem>>, %arg4: memref<8x128xf32, #tpu.memory_space<vmem>>, %arg5: memref<8x128xf32, #tpu.memory_space<vmem>>) attributes {dimension_semantics = [], scalar_prefetch = 0 : i64, scratch_operands = 0 : i64, tpu.core_type = #tpu.core_type<tc>} {
    %c0 = arith.constant 0 : index
    %c0_0 = arith.constant 0 : index
    %0 = vector.load %arg0[%c0, %c0_0] : memref<8x16xf32, #tpu.memory_space<vmem>>, vector<8x16xf32>
    %c0_1 = arith.constant 0 : index
    %c0_2 = arith.constant 0 : index
    %1 = vector.load %arg3[%c0_1, %c0_2] : memref<56x128xf32, #tpu.memory_space<vmem>>, vector<16x128xf32>
    %cst = arith.constant dense<0.000000e+00> : vector<8x128xf32>
    %2 = tpu.matmul %0, %1, %cst {dimension_numbers = #tpu.dot_dimension_numbers<[1], [0], [0], [1], [0, 0, 1, 1], [], []>} : vector<8x16xf32>, vector<16x128xf32>, vector<8x128xf32> -> vector<8x128xf32>
    %c0_3 = arith.constant 0 : index
    %c0_4 = arith.constant 0 : index
    %3 = vector.load %arg1[%c0_3, %c0_4] : memref<8x8xf32, #tpu.memory_space<vmem>>, vector<8x8xf32>
    %c16 = arith.constant 16 : index
    %c0_5 = arith.constant 0 : index
    %4 = vector.load %arg3[%c16, %c0_5] : memref<56x128xf32, #tpu.memory_space<vmem>>, vector<8x128xf32>
    %cst_6 = arith.constant dense<0.000000e+00> : vector<8x128xf32>
    %5 = tpu.matmul %3, %4, %cst_6 {dimension_numbers = #tpu.dot_dimension_numbers<[1], [0], [0], [1], [0, 0, 1, 1], [], []>} : vector<8x8xf32>, vector<8x128xf32>, vector<8x128xf32> -> vector<8x128xf32>
    %6 = arith.addf %2, %5 : vector<8x128xf32>
    %c0_7 = arith.constant 0 : index
    %c0_8 = arith.constant 0 : index
    %7 = vector.load %arg2[%c0_7, %c0_8] : memref<8x32xf32, #tpu.memory_space<vmem>>, vector<8x32xf32>
    %c24 = arith.constant 24 : index
    %c0_9 = arith.constant 0 : index
    %8 = vector.load %arg3[%c24, %c0_9] : memref<56x128xf32, #tpu.memory_space<vmem>>, vector<32x128xf32>
    %cst_10 = arith.constant dense<0.000000e+00> : vector<8x128xf32>
    %9 = tpu.matmul %7, %8, %cst_10 {dimension_numbers = #tpu.dot_dimension_numbers<[1], [0], [0], [1], [0, 0, 1, 1], [], []>} : vector<8x32xf32>, vector<32x128xf32>, vector<8x128xf32> -> vector<8x128xf32>
    %10 = arith.addf %6, %9 : vector<8x128xf32>
    %c0_11 = arith.constant 0 : index
    %c0_12 = arith.constant 0 : index
    %11 = vector.load %arg4[%c0_11, %c0_12] : memref<8x128xf32, #tpu.memory_space<vmem>>, vector<1x128xf32>
    %12 = vector.broadcast %11 : vector<1x128xf32> to vector<8x128xf32>
    %13 = arith.addf %10, %12 : vector<8x128xf32>
    %c1 = arith.constant 1 : index
    %c0_13 = arith.constant 0 : index
    %14 = vector.load %arg4[%c1, %c0_13] : memref<8x128xf32, #tpu.memory_space<vmem>>, vector<1x128xf32>
    %c2 = arith.constant 2 : index
    %c0_14 = arith.constant 0 : index
    %15 = vector.load %arg4[%c2, %c0_14] : memref<8x128xf32, #tpu.memory_space<vmem>>, vector<1x128xf32>
    %cst_15 = arith.constant dense<0.000000e+00> : vector<128xf32>
    %16 = vector.multi_reduction <add>, %13, %cst_15 [0] : vector<8x128xf32> to vector<128xf32>
    %17 = vector.shape_cast %16 : vector<128xf32> to vector<1x128xf32>
    %18 = arith.mulf %13, %13 : vector<8x128xf32>
    %cst_16 = arith.constant dense<0.000000e+00> : vector<128xf32>
    %19 = vector.multi_reduction <add>, %18, %cst_16 [0] : vector<8x128xf32> to vector<128xf32>
    %20 = vector.shape_cast %19 : vector<128xf32> to vector<1x128xf32>
    %cst_17 = arith.constant 1.250000e-01 : f32
    %21 = vector.broadcast %cst_17 : f32 to vector<1x128xf32>
    %22 = arith.mulf %17, %21 : vector<1x128xf32>
    %cst_18 = arith.constant 1.250000e-01 : f32
    %23 = vector.broadcast %cst_18 : f32 to vector<1x128xf32>
    %24 = arith.mulf %20, %23 : vector<1x128xf32>
    %25 = arith.mulf %22, %22 : vector<1x128xf32>
    %26 = arith.subf %24, %25 : vector<1x128xf32>
    %cst_19 = arith.constant 0.000000e+00 : f32
    %27 = vector.broadcast %cst_19 : f32 to vector<1x128xf32>
    %28 = arith.maximumf %26, %27 : vector<1x128xf32>
    %cst_20 = arith.constant 9.99999974E-6 : f32
    %29 = vector.broadcast %cst_20 : f32 to vector<1x128xf32>
    %30 = arith.addf %28, %29 : vector<1x128xf32>
    %31 = math.rsqrt %30 : vector<1x128xf32>
    %32 = arith.mulf %14, %31 : vector<1x128xf32>
    %33 = arith.mulf %22, %32 : vector<1x128xf32>
    %34 = arith.subf %15, %33 : vector<1x128xf32>
    %35 = vector.broadcast %32 : vector<1x128xf32> to vector<8x128xf32>
    %36 = arith.mulf %13, %35 : vector<8x128xf32>
    %37 = vector.broadcast %34 : vector<1x128xf32> to vector<8x128xf32>
    %38 = arith.addf %36, %37 : vector<8x128xf32>
    %39 = arith.negf %38 : vector<8x128xf32>
    %40 = math.exp %39 : vector<8x128xf32>
    %cst_21 = arith.constant 1.000000e+00 : f32
    %41 = vector.broadcast %cst_21 : f32 to vector<8x128xf32>
    %42 = arith.addf %41, %40 : vector<8x128xf32>
    %43 = arith.divf %41, %42 : vector<8x128xf32>
    %c0_22 = arith.constant 0 : index
    %c0_23 = arith.constant 0 : index
    %44 = vector.load %arg5[%c0_22, %c0_23] : memref<8x128xf32, #tpu.memory_space<vmem>>, vector<8x128xf32>
    tpu.vector_store %arg5[%c0_22, %c0_23], %43 {strides = array<i32>} : memref<8x128xf32, #tpu.memory_space<vmem>>, vector<8x128xf32>,
    return
  }
}

</mosaic_0001>

<bundles_post_ra>
// kernel: tpu_custom_call.1
= control target key start
LH: loop header
LB: loop body
LE: loop exit
PB: predicated region body
PF: predicated region fallthrough
CT: control target
= control target key end

     0   :  { %10 = vsyncpa [#allocation3], 0  ;;  %s481_s0 = inlined_call_operand.hbm [shape: f32[8,16], index: 0, kind: input, shape index: {}]   ;;  %s482_s1 = inlined_call_operand.hbm [shape: f32[8,8], index: 1, kind: input, shape index: {}]   ;;  %s483_s2 = inlined_call_operand.hbm [shape: f32[8,32], index: 2, kind: input, shape index: {}]   ;;  %s484_s3 = inlined_call_operand.hbm [shape: f32[56,128], index: 3, kind: input, shape index: {}]   ;;  %s485_s4 = inlined_call_operand.hbm [shape: f32[8,128], index: 4, kind: input, shape index: {}]   ;;  %s486_s5 = inlined_call_operand.hbm [shape: f32[8,128], index: 5, kind: output, shape index: {}]  }
   0x1   :  { %11 = vsyncpa [#allocation6], 0 }
   0x2   :  { %12 = vsyncpa [#allocation9], 0  ;;  %s30_s20 = sshll.u32 %s482_s1, 4  ;;  %s31_s20 = int_to_ptr.hbm [resolvable:$true] %s30_s20 }
   0x3   :  { %13 = vsyncpa [#allocation4], 0  ;;  %s425_s21 = smov [#allocation5]   ;;  %s51_s25 = sshll.u32 %s484_s3, 4  ;;  %s52_s25 = int_to_ptr.hbm [resolvable:$true] %s51_s25 }
   0x4   :  { %s32_s22 = sshll.u32 %s425_s21, 4  ;;  %s426_s26 = smov [#allocation8]   ;;  %s33_s22 = int_to_ptr.vmem [resolvable:$true] %s32_s22 }
   0x5   :  { %35 = dma.hbm_to_vmem [thread:$0]  %s31_s20, 128, %s33_s22, [#allocation6]  }
   0x6   :  { %s53_s27 = sshll.u32 %s426_s26, 4  ;;  %s427_s28 = smov 128   ;;  %s54_s27 = int_to_ptr.vmem [resolvable:$true] %s53_s27 }
   0x7   :  { %s428_s29 = smov 8   ;;  %s19_s1 = sshll.u32 %s481_s0, 4  ;;  %s20_s1 = int_to_ptr.hbm [resolvable:$true] %s19_s1 }
   0x8   :  { %59 = dma.hbm_to_vmem [thread:$0]  %s52_s25, 896, %s54_s27, [#allocation9], %s427_s28, %s427_s28, %s428_s29  }
   0x9   :  { %s429_s7 = smov [#allocation2]   ;;  %s41_s3 = sshll.u32 %s483_s2, 4  ;;  %s42_s3 = int_to_ptr.hbm [resolvable:$true] %s41_s3 }
   0xa   :  { %s21_s8 = sshll.u32 %s429_s7, 4  ;;  %s430_s11 = smov [#allocation7]   ;;  %s22_s8 = int_to_ptr.vmem [resolvable:$true] %s21_s8 }
   0xb   :  { %24 = dma.hbm_to_vmem [thread:$0]  %s20_s1, 128, %s22_s8, [#allocation3]  }
   0xc   :  { %s43_s12 = sshll.u32 %s430_s11, 4  ;;  %s65_s15 = sshll.u32 %s485_s4, 4  ;;  %s44_s12 = int_to_ptr.vmem [resolvable:$true] %s43_s12  ;;  %s66_s15 = int_to_ptr.hbm [resolvable:$true] %s65_s15 }
   0xd   :  { %46 = dma.hbm_to_vmem [thread:$0]  %s42_s3, 128, %s44_s12, [#allocation6]  }
   0xe   :  { %s431_s0 = smov [#allocation10]  }
   0xf   :  { %s67_s16 = sshll.u32 %s431_s0, 4  ;;  %s68_s16 = int_to_ptr.vmem [resolvable:$true] %s67_s16 }
  0x10   :  { %70 = dma.hbm_to_vmem [thread:$0]  %s66_s15, 128, %s68_s16, [#allocation9]  }
  0x11   :  { %417 = dma.done.wait [#allocation3], 128  }
  0x12   :  { %418 = vsyncadd [#allocation3], 4294967168 }
  0x13   :  { %419 = dma.done.wait [#allocation6], 256  }
  0x14   :  { %420 = vsyncadd [#allocation6], 4294967040 }
  0x15   :  { %421 = dma.done.wait [#allocation9], 1024  }
  0x16   :  { %422 = vsyncadd [#allocation9], 4294966272  ;;  %v148_v0 = vld [vmem:[#allocation8 + $0x30] sm:$0xff]  ;;  %v147_v1 = vld [vmem:[#allocation8 + $0x28] sm:$0xff]  ;;  %vm96_vm0 = vcmask 64512   ;;  %vm120_vm1 = vcmask 130048  }
  0x17   :  { %165 = vmatpush.msra.mxu2 %v148_v0  ;;  %v146_v2 = vld [vmem:[#allocation8 + $0x20] sm:$0xff]  ;;  %v93_v3 = vld [vmem:[#allocation8 + $0x8] sm:$0xff]  ;;  %v95_v4 = vld [vmem:[#allocation8 + $0x10] sm:$0xff]  ;;  %vm149_vm2 = vcmask 261120   ;;  %s432_s2 = smov [#allocation11]   ;;  %s242_s19 = sshll.u32 %s486_s5, 4  ;;  %s243_s19 = int_to_ptr.hbm [resolvable:$true] %s242_s19 }
  0x18   :  { %138 = vmatpush.msra.mxu1 %v93_v3  ;;  %v92_v5 = vld [vmem:[#allocation8] sm:$0xff]  ;;  %v94_v6 = vld [vmem:[#allocation5] sm:$0xff]  ;;  %115 = vmatpush.msra.mxu0 %v95_v4  ;;  %v91_v7 = vld [vmem:[#allocation2] sm:$0xff]  ;;  %s240_s4 = sshll.u32 %s432_s2, 4  ;;  %s241_s4 = int_to_ptr.vmem [resolvable:$true] %s240_s4 }
  0x19   :  { %166 = vmatpush.msra.mxu2 %v147_v1  ;;  %v145_v8 = vld [vmem:[#allocation8 + $0x18] sm:$0xff]  ;;  %254 = vmatmul.msk.f32.vlgmr.msra.gmra.mxu0 %vm96_vm0, %v94_v6 }
  0x1a   :  { %139 = vmatpush.msra.mxu1 %v92_v5  ;;  %v144_v9 = vld [vmem:[#allocation7] sm:$0xff] }
  0x1b   :  { %167 = vmatpush.msra.mxu2 %v146_v2  ;;  %255 = vmatmul.msk.f32.vlgmr.msra.gmra.mxu1 %vm120_vm1, %v91_v7  ;;  %v266_v13 = vld [vmem:[#allocation10] ss:$0 sm:$0xff]  ;;  %v177_v41 = vld [vmem:[#allocation10 + $0x1] sm:$0x1]  ;;  %v178_v45 = vld [vmem:[#allocation10 + $0x2] sm:$0x1] }
  0x1d   :  { %168 = vmatpush.msra.mxu2 %v145_v8 }
  0x1e   :  { %256 = vmatmul.msk.f32.vlgmr.msra.gmra.mxu2 %vm149_vm2, %v144_v9 }
  0x96   :  { %v117_v10 = vpop.f32.mrf.mxu0 }
  0x98   :  { %v141_v11 = vpop.f32.mrf.mxu1 }
  0x99   :  { %v142_v12 = vadd.f32 %v141_v11, %v117_v10 }
  0xa1   :  { %v170_v14 = vpop.f32.mrf.mxu2 }
  0xa2   :  { %v173_v15 = vadd.f32 %v170_v14, %v142_v12 }
  0xa4   :  { %v176_v16 = vadd.f32 %v266_v13, %v173_v15 }
  0xa6   :  { %v179_v17 = vrot.slane %v176_v16, 4  ;;  %v185_v18 = vmul.f32 %v176_v16, %v176_v16 }
  0xa8   :  { %v180_v19 = vadd.f32 %v179_v17, %v176_v16  ;;  %v186_v20 = vrot.slane %v185_v18, 4 }
  0xaa   :  { %v181_v21 = vrot.slane %v180_v19, 2  ;;  %v187_v22 = vadd.f32 %v186_v20, %v185_v18 }
  0xac   :  { %v182_v23 = vadd.f32 %v181_v21, %v180_v19  ;;  %v188_v24 = vrot.slane %v187_v22, 2 }
  0xae   :  { %v183_v25 = vrot.slane %v182_v23, 1  ;;  %v189_v26 = vadd.f32 %v188_v24, %v187_v22 }
  0xb0   :  { %v184_v27 = vadd.f32 %v183_v25, %v182_v23  ;;  %v190_v28 = vrot.slane %v189_v26, 1 }
  0xb2   :  { %v191_v29 = vadd.f32 %v190_v28, %v189_v26  ;;  %v192_v30 = vmul.f32 0.125, %v184_v27 }
  0xb4   :  { %v193_v31 = vmul.f32 0.125, %v191_v29  ;;  %v194_v32 = vmul.f32 %v192_v30, %v192_v30 }
  0xb6   :  { %v195_v33 = vsub.f32 %v193_v31, %v194_v32 }
  0xb8   :  { %v196_v34 = vmax.f32 %v195_v33, 0.0 }
  0xba   :  { %v197_v35 = vadd.f32 1e-05, %v196_v34 }
  0xbc   :  { %267 = vrsqrt.f32 %v197_v35  ;;  %vm204_vm4 = vweird.f32 %v197_v35 }
  0xc2   :  { %v268_v36 = vpop.eup %267 }
  0xc3   :  { %v199_v37 = vmul.f32 %v268_v36, %v197_v35  ;;  %vm205_vm3 = vweird.f32 %v268_v36 }
  0xc4   :  { %vm206_vm5 = vmor %vm204_vm4, %vm205_vm3 }
  0xc5   :  { %v200_v38 = vmul.f32 %v268_v36, %v199_v37 }
  0xc7   :  { %v201_v39 = vmul.f32 0.5, %v200_v38 }
  0xc9   :  { %v202_v40 = vsub.f32 1.5, %v201_v39 }
  0xcb   :  { %v203_v42 = vmul.f32 %v268_v36, %v202_v40 }
  0xcd   :  { %v207_v43 = vsel %vm206_vm5, %v268_v36, %v203_v42 }
  0xce   :  { %v208_v44 = vmul.f32 %v207_v43, %v177_v41 }
  0xd0   :  { %v209_v46 = vmul.f32 %v208_v44, %v192_v30  ;;  %v211_v47 = vperm.slane %v208_v44, 0 }
  0xd2   :  { %v210_v48 = vsub.f32 %v178_v45, %v209_v46  ;;  %v212_v49 = vmul.f32 %v211_v47, %v176_v16 }
  0xd4   :  { %v213_v50 = vperm.slane %v210_v48, 0 }
  0xd6   :  { %v214_v51 = vadd.f32 %v213_v50, %v212_v49 }
  0xd8   :  { %v257_v52 = vmul.f32 -1.442695, %v214_v51 }
  0xda   :  { %269 = vpow2.f32 %v257_v52 }
  0xe0   :  { %v270_v53 = vpop.eup %269 }
  0xe1   :  { %v218_v54 = vadd.f32 1.0, %v270_v53 }
  0xe3   :  { %271 = vrcp.f32 %v218_v54  ;;  %v230_v58 = vand.u32 2147483648, %v218_v54  ;;  %v228_v60 = vand.u32 2147483647, %v218_v54  ;;  %vm224_vm7 = vweird.f32 %v218_v54 }
  0xe5   :  { %v231_v62 = vor.u32 1.1754944e-38, %v230_v58  ;;  %vm229_vm9 = vcmp.eq.f32.partialorder %v228_v60, 8.507059e+37 }
  0xe9   :  { %v272_v55 = vpop.eup %271 }
  0xea   :  { %v220_v56 = vmul.f32 %v272_v55, %v218_v54  ;;  %vm225_vm6 = vweird.f32 %v272_v55 }
  0xeb   :  { %vm226_vm8 = vmor %vm224_vm7, %vm225_vm6 }
  0xec   :  { %v221_v57 = vsub.f32 1.0, %v220_v56 }
  0xee   :  { %v222_v59 = vmul.f32 %v272_v55, %v221_v57 }
  0xf0   :  { %v223_v61 = vadd.f32 %v272_v55, %v222_v59 }
  0xf2   :  { %v227_v63 = vsel %vm226_vm8, %v272_v55, %v223_v61 }
  0xf3   :  { %v232_v0 = vsel %vm229_vm9, %v231_v62, %v227_v63 }
  0xf4   :  { %234 = vst [vmem:[#allocation11] sm:$0xff] %v232_v0 }
  0xf5   :  { %245 = dma.vmem_to_hbm [thread:$0]  %s241_s4, 128, %s243_s19, [#allocation4]  }
  0xf6   :  { %423 = dma.done.wait [#allocation4], 128  }
  0xf7   :  { %424 = vsyncadd [#allocation4], 4294967168 }
  0xf8   :  { %250 = vsyncpa [#allocation3], 1 }
  0xf9   :  { %251 = vsyncpa [#allocation6], 1 }
  0xfa   :  { %252 = vsyncpa [#allocation9], 1 }
  0xfb   :  { %253 = vsyncpa [#allocation4], 1 }

</bundles_post_ra>
